<compile_context>
chip_gen: v6e
topology: v6e:2x2x1
jax: 0.10.0
libtpu: 0.0.40
codegen_flags: <defaults>
</compile_context>

<pallas_src>
import functools
import math

import jax
import jax.numpy as jnp
from jax.experimental import pallas as pl
from jax.experimental.pallas import tpu as pltpu

LANE = 128
SUBLANE = 8


def _round_up(n, m):
    return ((n + m - 1) // m) * m


def _cdiv(a, b):
    return (a + b - 1) // b


def _embedding_mlp_kernel(x_ref, w1_ref, w2_ref, w3_ref, w4_ref, o_ref, *,
                          compute_dtype):
    # x_ref: [TM, s+1] rows (last column is the ones column -> biases are
    # folded into the weights).  Pure dot -> relu chain, f32 accumulation.
    x = x_ref[...].astype(compute_dtype)
    h = jnp.maximum(jnp.dot(x, w1_ref[...],
                            preferred_element_type=jnp.float32), 0.0)
    h = jnp.maximum(jnp.dot(h.astype(compute_dtype), w2_ref[...],
                            preferred_element_type=jnp.float32), 0.0)
    h = jnp.maximum(jnp.dot(h.astype(compute_dtype), w3_ref[...],
                            preferred_element_type=jnp.float32), 0.0)
    o = jnp.dot(h.astype(compute_dtype), w4_ref[...],
                preferred_element_type=jnp.float32)
    o_ref[...] = o.astype(o_ref.dtype)          # full 128-lane unmasked store


def _prepare_params(params, compute_dtype):
    """Fold biases into weights and lane-pad the final layer.

    Hidden layers:  W_aug = [[W, 0], [b, 1]]  (in+1, out+1); ReLU keeps the
    trailing ones column alive so the fold composes across layers.
    Last layer:     W_aug = [[W], [b]] padded to a multiple of 128 out lanes.
    """
    w1, b1, w2, b2, w3, b3, w4, b4 = params

    def aug_hidden(w, b):
        fi, fo = w.shape
        top = jnp.concatenate([w, jnp.zeros((fi, 1), w.dtype)], axis=1)
        bot = jnp.concatenate([b.reshape(1, fo), jnp.ones((1, 1), w.dtype)],
                              axis=1)
        return jnp.concatenate([top, bot], axis=0)

    out_dim = w4.shape[1]                       # g*c + 1
    out_pad = _round_up(out_dim, LANE)
    w4_aug = jnp.concatenate([w4, b4.reshape(1, out_dim)], axis=0)
    w4_aug = jnp.pad(w4_aug, ((0, 0), (0, out_pad - out_dim)))
    ws = (aug_hidden(w1, b1), aug_hidden(w2, b2), aug_hidden(w3, b3), w4_aug)
    return tuple(w.astype(compute_dtype) for w in ws), out_dim, out_pad


def embedding_forward(x, params, *, c, g, tile_m=2048,
                      compute_dtype=jnp.bfloat16):
    """x: [n_particles, s].

    Returns (g_out [n_particles, c, g], g_sel_logit [n_particles, 1]) in f32.
    compute_dtype=jnp.float32 gives exact parity with the f32 reference;
    bf16 (default) is the v6e/v7x-friendly path (f32 MXU accumulation kept).
    """
    (w1, w2, w3, w4), out_dim, out_pad = _prepare_params(params, compute_dtype)
    M, s = x.shape
    assert out_dim == g * c + 1

    # Balanced row tiling: big enough to amortize ~0.35us/step pipeline
    # overhead, without padding M up to a full extra tile.
    tile_m = max(SUBLANE, min(_round_up(tile_m, SUBLANE), _round_up(M, SUBLANE)))
    n_tiles = _cdiv(M, tile_m)
    tile_m = _round_up(_cdiv(M, n_tiles), SUBLANE)
    M_pad = n_tiles * tile_m

    # Zero-pad rows, append the ones column (bias fold).  Padded rows produce
    # bias-driven garbage that is sliced off below.
    x = x.astype(compute_dtype)
    x = jnp.pad(x, ((0, M_pad - M), (0, 0)))
    x_aug = jnp.concatenate([x, jnp.ones((M_pad, 1), dtype=compute_dtype)],
                            axis=1)                     # [M_pad, s+1]

    def w_spec(arr):
        return pl.BlockSpec(arr.shape, lambda i: (0, 0))

    o_pad = pl.pallas_call(
        functools.partial(_embedding_mlp_kernel, compute_dtype=compute_dtype),
        out_shape=jax.ShapeDtypeStruct((M_pad, out_pad), jnp.float32),
        grid_spec=pltpu.PrefetchScalarGridSpec(
            num_scalar_prefetch=0,
            grid=(n_tiles,),
            in_specs=[
                pl.BlockSpec((tile_m, s + 1), lambda i: (i, 0)),
                w_spec(w1), w_spec(w2), w_spec(w3), w_spec(w4),
            ],
            out_specs=pl.BlockSpec((tile_m, out_pad), lambda i: (i, 0)),
        ),
        compiler_params=pltpu.CompilerParams(
            dimension_semantics=("parallel",),      # rows independent
            vmem_limit_bytes=32 * 1024 * 1024,
        ),
    )(x_aug, w1, w2, w3, w4)

    g_sel_logit = o_pad[:M, :1]
    g_out = o_pad[:M, 1:out_dim].reshape(M, c, g)
    return g_out, g_sel_logit


def init_params(key, s, hidden_size, c, g):
    """Xavier-normal weights, zero biases (matches the module's __init__).
    Weights are stored as [in, out] (transpose of torch Linear)."""
    dims = [(s, hidden_size), (hidden_size, hidden_size),
            (hidden_size, hidden_size), (hidden_size, g * c + 1)]
    params = []
    for (fan_in, fan_out) in dims:
        key, sub = jax.random.split(key)
        std = math.sqrt(2.0 / (fan_in + fan_out))
        w = std * jax.random.normal(sub, (fan_in, fan_out), dtype=jnp.float32)
        b = jnp.zeros((1, fan_out), dtype=jnp.float32)
        params.extend([w, b])
    return tuple(params)


def _reference_forward(x, params, *, c, g):
    w1, b1, w2, b2, w3, b3, w4, b4 = params
    h = jax.nn.relu(x @ w1 + b1)
    h = jax.nn.relu(h @ w2 + b2)
    h = jax.nn.relu(h @ w3 + b3)
    o = h @ w4 + b4
    return o[:, 1:].reshape(-1, c, g), o[:, :1]


if __name__ == "__main__":
    # Small shapes consistent with the forward: x = [n_particles, s].
    n_particles, s = 50, 16          # 50 exercises row padding (not a multiple of 8)
    hidden_size, c, g = 32, 4, 4     # output width = g*c + 1 = 17

    key = jax.random.PRNGKey(0)
    kx, kp = jax.random.split(key)
    x = jax.random.normal(kx, (n_particles, s), dtype=jnp.float32)
    params = init_params(kp, s, hidden_size, c, g)

    ref_g_out, ref_logit = _reference_forward(x, params, c=c, g=g)

    # Exact-parity f32 path.
    g_out32, logit32 = embedding_forward(x, params, c=c, g=g,
                                         compute_dtype=jnp.float32)
    g_out32 = jax.block_until_ready(g_out32)
    logit32 = jax.block_until_ready(logit32)
    assert g_out32.shape == (n_particles, c, g)
    assert logit32.shape == (n_particles, 1)
    assert jnp.allclose(g_out32, ref_g_out, atol=1e-5, rtol=1e-5)
    assert jnp.allclose(logit32, ref_logit, atol=1e-5, rtol=1e-5)

    # bf16-compute path (v6e/v7x recommendation): looser tolerance.
    g_out16, logit16 = embedding_forward(x, params, c=c, g=g,
                                         compute_dtype=jnp.bfloat16)
    g_out16 = jax.block_until_ready(g_out16)
    logit16 = jax.block_until_ready(logit16)
    assert g_out16.shape == (n_particles, c, g)
    assert logit16.shape == (n_particles, 1)
    assert jnp.allclose(g_out16, ref_g_out, atol=5e-2, rtol=5e-2)
    assert jnp.allclose(logit16, ref_logit, atol=5e-2, rtol=5e-2)

    print("KERNEL_OK")
</pallas_src>

<mosaic_0001>
module attributes {stable_mosaic.version = 11 : i64} {
  func.func @_embedding_mlp_kernel(%arg0: i32, %arg1: memref<56x17xf32, #tpu.memory_space<vmem>>, %arg2: memref<17x33xf32, #tpu.memory_space<vmem>>, %arg3: memref<33x33xf32, #tpu.memory_space<vmem>>, %arg4: memref<33x33xf32, #tpu.memory_space<vmem>>, %arg5: memref<33x128xf32, #tpu.memory_space<vmem>>, %arg6: memref<56x128xf32, #tpu.memory_space<vmem>>) attributes {dimension_semantics = [#tpu.dimension_semantics<parallel>], iteration_bounds = array<i64: 1>, scalar_prefetch = 0 : i64, scratch_operands = 0 : i64, tpu.core_type = #tpu.core_type<tc>, window_params = [{transform_indices = @transform_0, window_bounds = array<i64: 56, 17>}, {pipeline_mode = #tpu.pipeline_mode<synchronous>, transform_indices = @transform_1, window_bounds = array<i64: 17, 33>}, {pipeline_mode = #tpu.pipeline_mode<synchronous>, transform_indices = @transform_2, window_bounds = array<i64: 33, 33>}, {pipeline_mode = #tpu.pipeline_mode<synchronous>, transform_indices = @transform_3, window_bounds = array<i64: 33, 33>}, {pipeline_mode = #tpu.pipeline_mode<synchronous>, transform_indices = @transform_4, window_bounds = array<i64: 33, 128>}, {transform_indices = @transform_5, window_bounds = array<i64: 56, 128>}]} {
    %c0 = arith.constant 0 : index
    %c0_0 = arith.constant 0 : index
    %0 = vector.load %arg1[%c0, %c0_0] : memref<56x17xf32, #tpu.memory_space<vmem>>, vector<56x17xf32>
    %c0_1 = arith.constant 0 : index
    %c0_2 = arith.constant 0 : index
    %1 = vector.load %arg2[%c0_1, %c0_2] : memref<17x33xf32, #tpu.memory_space<vmem>>, vector<17x33xf32>
    %cst = arith.constant dense<0.000000e+00> : vector<56x33xf32>
    %2 = tpu.matmul %0, %1, %cst {dimension_numbers = #tpu.dot_dimension_numbers<[1], [0], [0], [1], [0, 0, 1, 1], [], []>} : vector<56x17xf32>, vector<17x33xf32>, vector<56x33xf32> -> vector<56x33xf32>
    %cst_3 = arith.constant 0.000000e+00 : f32
    %3 = vector.broadcast %cst_3 : f32 to vector<56x33xf32>
    %4 = arith.maximumf %2, %3 : vector<56x33xf32>
    %c0_4 = arith.constant 0 : index
    %c0_5 = arith.constant 0 : index
    %5 = vector.load %arg3[%c0_4, %c0_5] : memref<33x33xf32, #tpu.memory_space<vmem>>, vector<33x33xf32>
    %cst_6 = arith.constant dense<0.000000e+00> : vector<56x33xf32>
    %6 = tpu.matmul %4, %5, %cst_6 {dimension_numbers = #tpu.dot_dimension_numbers<[1], [0], [0], [1], [0, 0, 1, 1], [], []>} : vector<56x33xf32>, vector<33x33xf32>, vector<56x33xf32> -> vector<56x33xf32>
    %cst_7 = arith.constant 0.000000e+00 : f32
    %7 = vector.broadcast %cst_7 : f32 to vector<56x33xf32>
    %8 = arith.maximumf %6, %7 : vector<56x33xf32>
    %c0_8 = arith.constant 0 : index
    %c0_9 = arith.constant 0 : index
    %9 = vector.load %arg4[%c0_8, %c0_9] : memref<33x33xf32, #tpu.memory_space<vmem>>, vector<33x33xf32>
    %cst_10 = arith.constant dense<0.000000e+00> : vector<56x33xf32>
    %10 = tpu.matmul %8, %9, %cst_10 {dimension_numbers = #tpu.dot_dimension_numbers<[1], [0], [0], [1], [0, 0, 1, 1], [], []>} : vector<56x33xf32>, vector<33x33xf32>, vector<56x33xf32> -> vector<56x33xf32>
    %cst_11 = arith.constant 0.000000e+00 : f32
    %11 = vector.broadcast %cst_11 : f32 to vector<56x33xf32>
    %12 = arith.maximumf %10, %11 : vector<56x33xf32>
    %c0_12 = arith.constant 0 : index
    %c0_13 = arith.constant 0 : index
    %13 = vector.load %arg5[%c0_12, %c0_13] : memref<33x128xf32, #tpu.memory_space<vmem>>, vector<33x128xf32>
    %cst_14 = arith.constant dense<0.000000e+00> : vector<56x128xf32>
    %14 = tpu.matmul %12, %13, %cst_14 {dimension_numbers = #tpu.dot_dimension_numbers<[1], [0], [0], [1], [0, 0, 1, 1], [], []>} : vector<56x33xf32>, vector<33x128xf32>, vector<56x128xf32> -> vector<56x128xf32>
    %c0_15 = arith.constant 0 : index
    %c0_16 = arith.constant 0 : index
    %15 = vector.load %arg6[%c0_15, %c0_16] : memref<56x128xf32, #tpu.memory_space<vmem>>, vector<56x128xf32>
    tpu.vector_store %arg6[%c0_15, %c0_16], %14 {strides = array<i32>} : memref<56x128xf32, #tpu.memory_space<vmem>>, vector<56x128xf32>,
    return
  }
  func.func @transform_0(%arg0: i32) -> (i32, i32) {
    %c0_i32 = arith.constant 0 : i32
    %c0_i32_0 = arith.constant 0 : i32
    return %arg0, %c0_i32 : i32, i32
  }
  func.func @transform_1(%arg0: i32) -> (i32, i32) {
    %c0_i32 = arith.constant 0 : i32
    %c0_i32_0 = arith.constant 0 : i32
    %c0_i32_1 = arith.constant 0 : i32
    return %c0_i32, %c0_i32_0 : i32, i32
  }
  func.func @transform_2(%arg0: i32) -> (i32, i32) {
    %c0_i32 = arith.constant 0 : i32
    %c0_i32_0 = arith.constant 0 : i32
    %c0_i32_1 = arith.constant 0 : i32
    return %c0_i32, %c0_i32_0 : i32, i32
  }
  func.func @transform_3(%arg0: i32) -> (i32, i32) {
    %c0_i32 = arith.constant 0 : i32
    %c0_i32_0 = arith.constant 0 : i32
    %c0_i32_1 = arith.constant 0 : i32
    return %c0_i32, %c0_i32_0 : i32, i32
  }
  func.func @transform_4(%arg0: i32) -> (i32, i32) {
    %c0_i32 = arith.constant 0 : i32
    %c0_i32_0 = arith.constant 0 : i32
    %c0_i32_1 = arith.constant 0 : i32
    return %c0_i32, %c0_i32_0 : i32, i32
  }
  func.func @transform_5(%arg0: i32) -> (i32, i32) {
    %c0_i32 = arith.constant 0 : i32
    %c0_i32_0 = arith.constant 0 : i32
    return %arg0, %c0_i32 : i32, i32
  }
}

</mosaic_0001>

<bundles_post_ra>
// kernel: tpu_custom_call.1
= control target key start
LH: loop header
LB: loop body
LE: loop exit
PB: predicated region body
PF: predicated region fallthrough
CT: control target
= control target key end

     0   :  { %10 = vsyncpa [#allocation3], 0  ;;  %s1102_s0 = inlined_call_operand.vmem [shape: f32[56,17], index: 0, kind: input, shape index: {}]   ;;  %s1103_s1 = inlined_call_operand.hbm [shape: f32[17,33], index: 1, kind: input, shape index: {}]   ;;  %s1104_s2 = inlined_call_operand.vmem [shape: f32[33,33], index: 2, kind: input, shape index: {}]   ;;  %s1105_s3 = inlined_call_operand.vmem [shape: f32[33,33], index: 3, kind: input, shape index: {}]   ;;  %s1106_s4 = inlined_call_operand.hbm [shape: f32[33,128], index: 4, kind: input, shape index: {}]   ;;  %s1107_s5 = inlined_call_operand.hbm [shape: f32[56,128], index: 5, kind: output, shape index: {}]  }
   0x1   :  { %11 = vsyncpa [#allocation6], 0 }
   0x2   :  { %12 = vsyncpa [#allocation4], 0  ;;  %s890_s18 = smov [#allocation2]  }
   0x3   :  { %s20_s19 = sshll.u32 %s890_s18, 4  ;;  %s21_s19 = int_to_ptr.vmem [resolvable:$true] %s20_s19 }
   0x4   :  { %s832_s20 = scalar_lea.vmem %s21_s19, 384  ;;  %p837_p1 = scmp.lt.s32.totalorder %s21_s19, %s21_s19 }
   0x5   :  { %p833_p0 = scmp.ne.s32.totalorder %s21_s19, %s832_s20  ;;  %p838_p2 = scmp.lt.s32.totalorder %s832_s20, %s832_s20 }
   0x7   :  { %p839_p3 = por %p838_p2, %p837_p1 }
   0x9   :  { %p840_p4 = pnand %p839_p3, %p833_p0 }
   0xb   :  { %843 = shalt.err (!%p840_p4)
}
   0xc   :  { %s891_s21 = smov 128   ;;  %s892_s22 = smov 8  }
   0xd   :  { %26 = dma.hbm_to_vmem [thread:$0]  %s1103_s1, 384, %s21_s19, [#allocation3], %s891_s21, %s891_s21, %s892_s22  }
   0xe   :  { %s893_s25 = smov [#allocation5]  }
   0xf   :  { %s36_s26 = sshll.u32 %s893_s25, 4  ;;  %s37_s26 = int_to_ptr.vmem [resolvable:$true] %s36_s26 }
  0x10   :  { %s852_s27 = scalar_lea.vmem %s37_s26, 640  ;;  %p857_p6 = scmp.lt.s32.totalorder %s37_s26, %s37_s26 }
  0x11   :  { %p853_p5 = scmp.ne.s32.totalorder %s37_s26, %s852_s27  ;;  %p858_p7 = scmp.lt.s32.totalorder %s852_s27, %s852_s27 }
  0x13   :  { %p859_p8 = por %p858_p7, %p857_p6 }
  0x15   :  { %p860_p9 = pnand %p859_p8, %p853_p5 }
  0x17   :  { %863 = shalt.err (!%p860_p9)
}
  0x18   :  { %42 = dma.hbm_to_vmem [thread:$0]  %s1106_s4, 640, %s37_s26, [#allocation6], %s891_s21, %s891_s21, %s892_s22  }
  0x19   :  { %884 = dma.done.wait [#allocation3], 384  }
  0x1a   :  { %885 = vsyncadd [#allocation3], 4294966912 }
  0x1b   :  { %886 = dma.done.wait [#allocation6], 640  }
  0x1c   :  { %887 = vsyncadd [#allocation6], 4294966656  ;;  %v894_v0 = vmov 0.0   ;;  %vm895_vm0 = vmmov 0   ;;  %vm81_vm1 = vcmask 1040384   ;;  %v57_v2 = vld [vmem:[#allocation2 + $0x8] sm:$0xff] }
  0x1d   :  { %697 = vmatprep.subr.mxu0 %v894_v0  ;;  %703 = vmatprep.mubr.msk.f32.mxu0 %vm895_vm0, %v894_v0  ;;  %v58_v1 = vld [vmem:[#allocation2 + $0x10] sm:$0x1]  ;;  %v56_v3 = vld [vmem:[#allocation2] sm:$0xff]  ;;  %vm59_vm2 = vcmask 138240   ;;  %v195_v6 = vld [vmem:[%s1104_s2 + $0x18] sm:$0xff]  ;;  %vm197_vm3 = vcmask 269312  }
  0x1e   :  { %724 = vmatprep.subr.mxu1 %v894_v0  ;;  %734 = vmatprep.mubr.msk.f32.mxu1 %vm895_vm0, %v894_v0  ;;  %v49_v4 = vld [vmem:[%s1102_s0] sm:$0xff]  ;;  %v194_v7 = vld [vmem:[%s1104_s2 + $0x10] sm:$0xff]  ;;  %v50_v8 = vld [vmem:[%s1102_s0 + $0x8] sm:$0xff] }
  0x1f   :  { %698 = vmatpush3.msk.msra.mxu0 %vm81_vm1, %v58_v1  ;;  %v196_v5 = vld [vmem:[%s1104_s2 + $0x20] sm:$0x1]  ;;  %v51_v9 = vld [vmem:[%s1102_s0 + $0x10] sm:$0xff]  ;;  %v52_v10 = vld [vmem:[%s1102_s0 + $0x18] sm:$0xff] }
  0x20   :  { %699 = vmatprep.subr.mxu0 %v894_v0  ;;  %725 = vmatpush3.msk.msra.mxu1 %vm81_vm1, %v196_v5  ;;  %v53_v11 = vld [vmem:[%s1102_s0 + $0x20] sm:$0xff]  ;;  %v54_v12 = vld [vmem:[%s1102_s0 + $0x28] sm:$0xff]  ;;  %v55_v13 = vld [vmem:[%s1102_s0 + $0x30] sm:$0xff] }
  0x21   :  { %700 = vmatpush3.msra.mxu0 %v57_v2  ;;  %726 = vmatprep.subr.mxu1 %v894_v0  ;;  %v193_v14 = vld [vmem:[%s1104_s2 + $0x8] sm:$0xff]  ;;  %v192_v15 = vld [vmem:[%s1104_s2] sm:$0xff]  ;;  %v332_v17 = vld [vmem:[%s1105_s3 + $0x18] sm:$0xff] }
  0x22   :  { %701 = vmatprep.subr.mxu0 %v894_v0  ;;  %727 = vmatpush3.msra.mxu1 %v195_v6  ;;  %v333_v16 = vld [vmem:[%s1105_s3 + $0x20] sm:$0x1]  ;;  %v331_v18 = vld [vmem:[%s1105_s3 + $0x10] sm:$0xff]  ;;  %v330_v19 = vld [vmem:[%s1105_s3 + $0x8] sm:$0xff] }
  0x23   :  { %702 = vmatpush3.msra.mxu0 %v56_v3  ;;  %728 = vmatprep.subr.mxu1 %v894_v0  ;;  %v329_v20 = vld [vmem:[%s1105_s3] sm:$0xff]  ;;  %v469_v42 = vld [vmem:[#allocation5 + $0x20] sm:$0x1]  ;;  %v468_v43 = vld [vmem:[#allocation5 + $0x18] sm:$0xff]  ;;  %s896_s3 = smov [#allocation7]  }
  0x24   :  { %704 = vmatmul.mubr.msk.f32.vlgmr.msra.gmra.mxu0 %vm59_vm2, %v49_v4  ;;  %729 = vmatpush3.msra.mxu1 %v194_v7  ;;  %v467_v44 = vld [vmem:[#allocation5 + $0x10] sm:$0xff]  ;;  %v466_v45 = vld [vmem:[#allocation5 + $0x8] sm:$0xff]  ;;  %v465_v46 = vld [vmem:[#allocation5] sm:$0xff]  ;;  %s606_s10 = sshll.u32 %s896_s3, 4  ;;  %s607_s10 = int_to_ptr.vmem [resolvable:$true] %s606_s10 }
  0x25   :  { %706 = vmatprep.mubr.msk.f32.mxu0 %vm895_vm0, %v894_v0  ;;  %755 = vmatprep.subr.mxu0 %v894_v0  ;;  %s864_s11 = scalar_lea.vmem %s607_s10, 896  ;;  %p869_p11 = scmp.lt.s32.totalorder %s607_s10, %s607_s10 }
  0x26   :  { %730 = vmatprep.subr.mxu1 %v894_v0  ;;  %756 = vmatpush3.msk.msra.mxu0 %vm81_vm1, %v333_v16  ;;  %p865_p10 = scmp.ne.s32.totalorder %s607_s10, %s864_s11  ;;  %p870_p12 = scmp.lt.s32.totalorder %s864_s11, %s864_s11 }
  0x27   :  { %731 = vmatpush3.msra.mxu1 %v193_v14  ;;  %757 = vmatprep.subr.mxu0 %v894_v0 }
  0x28   :  { %707 = vmatmul.mubr.msk.f32.gmra.mxu0 %vm59_vm2, %v50_v8  ;;  %732 = vmatprep.subr.mxu1 %v894_v0  ;;  %p871_p13 = por %p870_p12, %p869_p11 }
  0x29   :  { %709 = vmatprep.mubr.msk.f32.mxu0 %vm895_vm0, %v894_v0  ;;  %733 = vmatpush3.msra.mxu1 %v192_v15 }
  0x2a   :  { %786 = vmatprep.subr.mxu1 %v894_v0  ;;  %758 = vmatpush3.msra.mxu0 %v332_v17  ;;  %p872_p0 = pnand %p871_p13, %p865_p10 }
  0x2b   :  { %759 = vmatprep.subr.mxu0 %v894_v0 }
  0x2c   :  { %710 = vmatmul.mubr.msk.f32.gmra.mxu0 %vm59_vm2, %v51_v9 }
  0x2d   :  { %712 = vmatprep.mubr.msk.f32.mxu0 %vm895_vm0, %v894_v0  ;;  %760 = vmatpush3.msra.mxu0 %v331_v18 }
  0x2e   :  { %761 = vmatprep.subr.mxu0 %v894_v0 }
  0x2f   :  { %762 = vmatpush3.msra.mxu0 %v330_v19 }
  0x30   :  { %713 = vmatmul.mubr.msk.f32.gmra.mxu0 %vm59_vm2, %v52_v10  ;;  %763 = vmatprep.subr.mxu0 %v894_v0 }
  0x31   :  { %715 = vmatprep.mubr.msk.f32.mxu0 %vm895_vm0, %v894_v0  ;;  %764 = vmatpush3.msra.mxu0 %v329_v20 }
  0x34   :  { %716 = vmatmul.mubr.msk.f32.gmra.mxu0 %vm59_vm2, %v53_v11 }
  0x35   :  { %718 = vmatprep.mubr.msk.f32.mxu0 %vm895_vm0, %v894_v0 }
  0x38   :  { %719 = vmatmul.mubr.msk.f32.gmra.mxu0 %vm59_vm2, %v54_v12 }
  0x39   :  { %721 = vmatprep.mubr.msk.f32.mxu0 %vm895_vm0, %v894_v0 }
  0x3c   :  { %722 = vmatmul.mubr.msk.f32.gmra.mxu0 %vm59_vm2, %v55_v13 }
  0x3d   :  { %765 = vmatprep.mubr.msk.f32.mxu0 %vm895_vm0, %v894_v0 }
  0xe4   :  { %v151_v21 = vpop.f32.mrf.mxu0 }
  0xe5   :  { %v185_v22 = vmax.f32 %v151_v21, 0.0 }
  0xe6   :  { %v705_v23 = vpop.f32.mrf.mxu0 }
  0xe7   :  { %735 = vmatmul.mubr.msk.f32.vlgmr.msra.gmra.mxu1 %vm197_vm3, %v185_v22 }
  0xe8   :  { %v156_v24 = vpop.f32.mrf.mxu0  ;;  %737 = vmatprep.mubr.msk.f32.mxu1 %vm895_vm0, %v894_v0  ;;  %787 = vmatpush3.msk.msra.mxu1 %vm81_vm1, %v469_v42 }
  0xe9   :  { %v186_v25 = vmax.f32 %v156_v24, 0.0  ;;  %788 = vmatprep.subr.mxu1 %v894_v0 }
  0xea   :  { %v708_v26 = vpop.f32.mrf.mxu0  ;;  %789 = vmatpush3.msra.mxu1 %v468_v43 }
  0xeb   :  { %738 = vmatmul.mubr.msk.f32.gmra.mxu1 %vm197_vm3, %v186_v25  ;;  %790 = vmatprep.subr.mxu1 %v894_v0 }
  0xec   :  { %v161_v27 = vpop.f32.mrf.mxu0  ;;  %740 = vmatprep.mubr.msk.f32.mxu1 %vm895_vm0, %v894_v0  ;;  %791 = vmatpush3.msra.mxu1 %v467_v44 }
  0xed   :  { %v187_v28 = vmax.f32 %v161_v27, 0.0  ;;  %792 = vmatprep.subr.mxu1 %v894_v0 }
  0xee   :  { %v711_v29 = vpop.f32.mrf.mxu0  ;;  %793 = vmatpush3.msra.mxu1 %v466_v45 }
  0xef   :  { %741 = vmatmul.mubr.msk.f32.gmra.mxu1 %vm197_vm3, %v187_v28  ;;  %794 = vmatprep.subr.mxu1 %v894_v0 }
  0xf0   :  { %v166_v30 = vpop.f32.mrf.mxu0  ;;  %743 = vmatprep.mubr.msk.f32.mxu1 %vm895_vm0, %v894_v0  ;;  %795 = vmatpush3.msra.mxu1 %v465_v46 }
  0xf1   :  { %v188_v31 = vmax.f32 %v166_v30, 0.0 }
  0xf2   :  { %v714_v32 = vpop.f32.mrf.mxu0 }
  0xf3   :  { %744 = vmatmul.mubr.msk.f32.gmra.mxu1 %vm197_vm3, %v188_v31 }
  0xf4   :  { %v171_v33 = vpop.f32.mrf.mxu0  ;;  %746 = vmatprep.mubr.msk.f32.mxu1 %vm895_vm0, %v894_v0 }
  0xf5   :  { %v189_v34 = vmax.f32 %v171_v33, 0.0 }
  0xf6   :  { %v717_v35 = vpop.f32.mrf.mxu0 }
  0xf7   :  { %747 = vmatmul.mubr.msk.f32.gmra.mxu1 %vm197_vm3, %v189_v34 }
  0xf8   :  { %v176_v36 = vpop.f32.mrf.mxu0  ;;  %749 = vmatprep.mubr.msk.f32.mxu1 %vm895_vm0, %v894_v0 }
  0xf9   :  { %v190_v37 = vmax.f32 %v176_v36, 0.0 }
  0xfa   :  { %v720_v38 = vpop.f32.mrf.mxu0 }
  0xfb   :  { %750 = vmatmul.mubr.msk.f32.gmra.mxu1 %vm197_vm3, %v190_v37 }
  0xfc   :  { %v181_v39 = vpop.f32.mrf.mxu0  ;;  %752 = vmatprep.mubr.msk.f32.mxu1 %vm895_vm0, %v894_v0 }
  0xfd   :  { %v191_v40 = vmax.f32 %v181_v39, 0.0 }
  0xfe   :  { %v723_v41 = vpop.f32.mrf.mxu0 }
  0xff   :  { %753 = vmatmul.mubr.msk.f32.gmra.mxu1 %vm197_vm3, %v191_v40 }
 0x100   :  { %796 = vmatprep.mubr.msk.f32.mxu1 %vm895_vm0, %v894_v0 }
 0x1a7   :  { %v288_v47 = vpop.f32.mrf.mxu1 }
 0x1a8   :  { %v322_v48 = vmax.f32 %v288_v47, 0.0 }
 0x1a9   :  { %v736_v49 = vpop.f32.mrf.mxu1 }
 0x1aa   :  { %766 = vmatmul.mubr.msk.f32.vlgmr.msra.gmra.mxu0 %vm197_vm3, %v322_v48 }
 0x1ab   :  { %v293_v50 = vpop.f32.mrf.mxu1  ;;  %768 = vmatprep.mubr.msk.f32.mxu0 %vm895_vm0, %v894_v0 }
 0x1ac   :  { %v323_v51 = vmax.f32 %v293_v50, 0.0 }
 0x1ad   :  { %v739_v52 = vpop.f32.mrf.mxu1 }
 0x1ae   :  { %769 = vmatmul.mubr.msk.f32.gmra.mxu0 %vm197_vm3, %v323_v51 }
 0x1af   :  { %v298_v53 = vpop.f32.mrf.mxu1  ;;  %771 = vmatprep.mubr.msk.f32.mxu0 %vm895_vm0, %v894_v0 }
 0x1b0   :  { %v324_v54 = vmax.f32 %v298_v53, 0.0 }
 0x1b1   :  { %v742_v55 = vpop.f32.mrf.mxu1 }
 0x1b2   :  { %772 = vmatmul.mubr.msk.f32.gmra.mxu0 %vm197_vm3, %v324_v54 }
 0x1b3   :  { %v303_v56 = vpop.f32.mrf.mxu1  ;;  %774 = vmatprep.mubr.msk.f32.mxu0 %vm895_vm0, %v894_v0 }
 0x1b4   :  { %v325_v57 = vmax.f32 %v303_v56, 0.0 }
 0x1b5   :  { %v745_v58 = vpop.f32.mrf.mxu1 }
 0x1b6   :  { %775 = vmatmul.mubr.msk.f32.gmra.mxu0 %vm197_vm3, %v325_v57 }
 0x1b7   :  { %v308_v59 = vpop.f32.mrf.mxu1  ;;  %777 = vmatprep.mubr.msk.f32.mxu0 %vm895_vm0, %v894_v0 }
 0x1b8   :  { %v326_v60 = vmax.f32 %v308_v59, 0.0 }
 0x1b9   :  { %v748_v61 = vpop.f32.mrf.mxu1 }
 0x1ba   :  { %778 = vmatmul.mubr.msk.f32.gmra.mxu0 %vm197_vm3, %v326_v60 }
 0x1bb   :  { %v313_v62 = vpop.f32.mrf.mxu1  ;;  %780 = vmatprep.mubr.msk.f32.mxu0 %vm895_vm0, %v894_v0 }
 0x1bc   :  { %v327_v63 = vmax.f32 %v313_v62, 0.0 }
 0x1bd   :  { %v751_v1 = vpop.f32.mrf.mxu1 }
 0x1be   :  { %781 = vmatmul.mubr.msk.f32.gmra.mxu0 %vm197_vm3, %v327_v63 }
 0x1bf   :  { %v318_v2 = vpop.f32.mrf.mxu1  ;;  %783 = vmatprep.mubr.msk.f32.mxu0 %vm895_vm0, %v894_v0 }
 0x1c0   :  { %v328_v3 = vmax.f32 %v318_v2, 0.0 }
 0x1c1   :  { %v754_v4 = vpop.f32.mrf.mxu1 }
 0x1c2   :  { %784 = vmatmul.mubr.msk.f32.gmra.mxu0 %vm197_vm3, %v328_v3 }
 0x26a   :  { %v424_v5 = vpop.f32.mrf.mxu0 }
 0x26b   :  { %v458_v6 = vmax.f32 %v424_v5, 0.0 }
 0x26c   :  { %v767_v7 = vpop.f32.mrf.mxu0 }
 0x26d   :  { %797 = vmatmul.mubr.msk.f32.vlgmr.msra.gmra.mxu1 %vm197_vm3, %v458_v6 }
 0x26e   :  { %v429_v8 = vpop.f32.mrf.mxu0  ;;  %799 = vmatprep.mubr.msk.f32.mxu1 %vm895_vm0, %v894_v0 }
 0x26f   :  { %v459_v9 = vmax.f32 %v429_v8, 0.0 }
 0x270   :  { %v770_v10 = vpop.f32.mrf.mxu0 }
 0x271   :  { %800 = vmatmul.mubr.msk.f32.gmra.mxu1 %vm197_vm3, %v459_v9 }
 0x272   :  { %v434_v11 = vpop.f32.mrf.mxu0  ;;  %802 = vmatprep.mubr.msk.f32.mxu1 %vm895_vm0, %v894_v0 }
 0x273   :  { %v460_v12 = vmax.f32 %v434_v11, 0.0 }
 0x274   :  { %v773_v13 = vpop.f32.mrf.mxu0 }
 0x275   :  { %803 = vmatmul.mubr.msk.f32.gmra.mxu1 %vm197_vm3, %v460_v12 }
 0x276   :  { %v439_v14 = vpop.f32.mrf.mxu0  ;;  %805 = vmatprep.mubr.msk.f32.mxu1 %vm895_vm0, %v894_v0 }
 0x277   :  { %v461_v15 = vmax.f32 %v439_v14, 0.0 }
 0x278   :  { %v776_v16 = vpop.f32.mrf.mxu0 }
 0x279   :  { %806 = vmatmul.mubr.msk.f32.gmra.mxu1 %vm197_vm3, %v461_v15 }
 0x27a   :  { %v444_v17 = vpop.f32.mrf.mxu0  ;;  %808 = vmatprep.mubr.msk.f32.mxu1 %vm895_vm0, %v894_v0 }
 0x27b   :  { %v462_v18 = vmax.f32 %v444_v17, 0.0 }
 0x27c   :  { %v779_v19 = vpop.f32.mrf.mxu0 }
 0x27d   :  { %809 = vmatmul.mubr.msk.f32.gmra.mxu1 %vm197_vm3, %v462_v18 }
 0x27e   :  { %v449_v20 = vpop.f32.mrf.mxu0  ;;  %811 = vmatprep.mubr.msk.f32.mxu1 %vm895_vm0, %v894_v0 }
 0x27f   :  { %v463_v21 = vmax.f32 %v449_v20, 0.0 }
 0x280   :  { %v782_v22 = vpop.f32.mrf.mxu0 }
 0x281   :  { %812 = vmatmul.mubr.msk.f32.gmra.mxu1 %vm197_vm3, %v463_v21 }
 0x282   :  { %v454_v23 = vpop.f32.mrf.mxu0  ;;  %814 = vmatprep.mubr.msk.f32.mxu1 %vm895_vm0, %v894_v0 }
 0x283   :  { %v464_v24 = vmax.f32 %v454_v23, 0.0 }
 0x284   :  { %v785_v25 = vpop.f32.mrf.mxu0 }
 0x285   :  { %815 = vmatmul.mubr.msk.f32.gmra.mxu1 %vm197_vm3, %v464_v24 }
 0x32d   :  { %v560_v26 = vpop.f32.mrf.mxu1 }
 0x32e   :  { %594 = vst [vmem:[#allocation7] sm:$0xff] %v560_v26 }
 0x32f   :  { %v798_v27 = vpop.f32.mrf.mxu1 }
 0x331   :  { %v565_v28 = vpop.f32.mrf.mxu1 }
 0x332   :  { %595 = vst [vmem:[#allocation7 + $0x8] sm:$0xff] %v565_v28 }
 0x333   :  { %v801_v29 = vpop.f32.mrf.mxu1 }
 0x335   :  { %v570_v30 = vpop.f32.mrf.mxu1 }
 0x336   :  { %596 = vst [vmem:[#allocation7 + $0x10] sm:$0xff] %v570_v30 }
 0x337   :  { %v804_v31 = vpop.f32.mrf.mxu1 }
 0x339   :  { %v575_v32 = vpop.f32.mrf.mxu1 }
 0x33a   :  { %597 = vst [vmem:[#allocation7 + $0x18] sm:$0xff] %v575_v32 }
 0x33b   :  { %v807_v33 = vpop.f32.mrf.mxu1 }
 0x33d   :  { %v580_v34 = vpop.f32.mrf.mxu1 }
 0x33e   :  { %598 = vst [vmem:[#allocation7 + $0x20] sm:$0xff] %v580_v34 }
 0x33f   :  { %v810_v35 = vpop.f32.mrf.mxu1 }
 0x341   :  { %v585_v0 = vpop.f32.mrf.mxu1 }
 0x342   :  { %599 = vst [vmem:[#allocation7 + $0x28] sm:$0xff] %v585_v0 }
 0x343   :  { %v813_v36 = vpop.f32.mrf.mxu1 }
 0x345   :  { %v590_v37 = vpop.f32.mrf.mxu1 }
 0x346   :  { %600 = vst [vmem:[#allocation7 + $0x30] sm:$0xff] %v590_v37 }
 0x347   :  { %v816_v38 = vpop.f32.mrf.mxu1 }
 0x348   :  { %875 = shalt.err (!%p872_p0)
}
 0x349   :  { %612 = dma.vmem_to_hbm [thread:$0]  %s607_s10, 896, %s1107_s5, [#allocation4], %s891_s21, %s891_s21, %s892_s22  }
 0x34a   :  { %888 = dma.done.wait [#allocation4], 896  }
 0x34b   :  { %889 = vsyncadd [#allocation4], 4294966400 }
 0x34c   :  { %616 = vsyncpa [#allocation3], 1 }
 0x34d   :  { %617 = vsyncpa [#allocation6], 1 }
 0x34e   :  { %618 = vsyncpa [#allocation4], 1 }

</bundles_post_ra>
